<compile_context>
chip_gen: v6e
topology: v6e:2x2x1
jax: 0.10.0
libtpu: 0.0.40
codegen_flags: <defaults>
</compile_context>

<pallas_src>
import functools
import math

import jax
import jax.numpy as jnp
from jax import lax
from jax.experimental import pallas as pl
from jax.experimental.pallas import tpu as pltpu

COMPUTE_DTYPE = jnp.bfloat16          # MXU-native on v5e/v6e/v7x; acc stays f32
VMEM_LIMIT = 32 * 1024 * 1024         # explicit scoped-VMEM request, safe on all gens


def _round_up(x, m):
    return (x + m - 1) // m * m


# ----------------------------------------------------------------------------
# Kernel 1: row x col tiled linear; LoRA (and softmax scale) already folded
# into the weight.   y[i, j] = x[i, :] @ W_t[:, j] + b[j]
# ----------------------------------------------------------------------------
def _linear_kernel(x_ref, wt_ref, b_ref, o_ref):
    acc = jnp.dot(x_ref[...], wt_ref[...], preferred_element_type=jnp.float32)
    o_ref[...] = (acc + b_ref[...]).astype(o_ref.dtype)


def fused_linear(x, w_t, b, *, out_dtype=COMPUTE_DTYPE, tile_n=512, tile_d=512):
    """x: (N, Din), w_t: (Din, Dout) merged+transposed, b: (Dout,) -> (N, Dout)."""
    n, din = x.shape
    dout = w_t.shape[1]

    tn = min(_round_up(tile_n, 8), _round_up(n, 8))
    td = dout if tile_d >= dout else max(128, tile_d // 128 * 128)
    # Expose >= 2 grid steps whenever possible so a v7x chip uses both TensorCores.
    if pl.cdiv(n, tn) * pl.cdiv(dout, td) == 1:
        if dout >= 256:
            td = _round_up(pl.cdiv(dout, 2), 128)
        elif n >= 16:
            tn = _round_up(pl.cdiv(n, 2), 8)

    x = x.astype(COMPUTE_DTYPE)        # halve DMA bytes; f32 accumulation in-kernel
    w_t = w_t.astype(COMPUTE_DTYPE)    # cast once here, not per tile in the kernel
    b2 = b.reshape(1, dout).astype(jnp.float32)

    grid = (pl.cdiv(n, tn), pl.cdiv(dout, td))   # ragged edges handled by Pallas
    return pl.pallas_call(
        _linear_kernel,
        grid=grid,
        in_specs=[
            pl.BlockSpec((tn, din), lambda i, j: (i, 0)),   # row-tiled activations
            pl.BlockSpec((din, td), lambda i, j: (0, j)),   # column-tiled weight
            pl.BlockSpec((1, td), lambda i, j: (0, j)),     # column-tiled bias
        ],
        out_specs=pl.BlockSpec((tn, td), lambda i, j: (i, j)),
        out_shape=jax.ShapeDtypeStruct((n, dout), out_dtype),
        compiler_params=pltpu.CompilerParams(
            dimension_semantics=("parallel", "parallel"),
            vmem_limit_bytes=VMEM_LIMIT,
        ),
    )(x, w_t, b2)


# ----------------------------------------------------------------------------
# Kernel 2: scaled dot-product attention.
#   grid = (batch, head_groups); per step the kernel loads lane-dense
#   (Lq, G*head_dim) / (Lk, G*head_dim) tiles (heads packed in the last dim),
#   runs per-head 2-D MXU matmuls + softmax, writes ctx back into the packed
#   layout and (optionally) accumulates head-averaged attention weights in the
#   resident (1, Lq, Lk) output block across the "arbitrary" head-group axis.
# ----------------------------------------------------------------------------
def _attn_kernel(q_ref, k_ref, v_ref, o_ref, wavg_ref=None, *,
                 heads_per_step, head_dim, inv_heads, with_weights):
    g = pl.program_id(1)
    q = q_ref[0]                                  # (Lq, W) bf16, scale pre-folded
    k = k_ref[0]                                  # (Lk, W) bf16
    v = v_ref[0]                                  # (Lk, W) bf16
    lq, lk = q.shape[0], k.shape[0]

    wsum = jnp.zeros((lq, lk), jnp.float32) if with_weights else None
    for h in range(heads_per_step):               # static unroll over packed heads
        sl = slice(h * head_dim, (h + 1) * head_dim)
        # scores = q_h @ k_h^T  (contract head_dim directly, no transpose in VMEM)
        s = lax.dot_general(q[:, sl], k[:, sl], (((1,), (1,)), ((), ())),
                            preferred_element_type=jnp.float32)        # (Lq, Lk)
        s = s - jnp.max(s, axis=-1, keepdims=True)
        p = jnp.exp(s)
        attn = p / jnp.sum(p, axis=-1, keepdims=True)                  # exact divide
        ctx = lax.dot_general(attn.astype(v.dtype), v[:, sl],
                              (((1,), (0,)), ((), ())),
                              preferred_element_type=jnp.float32)      # (Lq, hd)
        o_ref[0, :, sl] = ctx.astype(o_ref.dtype)
        if with_weights:
            wsum = wsum + attn

    if with_weights:
        @pl.when(g == 0)
        def _():
            wavg_ref[...] = jnp.zeros_like(wavg_ref)
        wavg_ref[0] += wsum * inv_heads


def _pick_head_group(num_heads, head_dim, lq, lk, budget_bytes=8 * 1024 * 1024):
    """Largest head group G (G | H) whose packed width G*head_dim is lane-dense
    (multiple of 128 or the full embed dim) and whose tiles fit the VMEM budget."""
    legal = [g for g in range(num_heads, 0, -1)
             if num_heads % g == 0 and ((g * head_dim) % 128 == 0 or g == num_heads)]
    for g in legal:
        w = g * head_dim
        tile_bytes = 2 * (lq * w + 2 * lk * w + lq * w) + 4 * lq * lk
        if tile_bytes <= budget_bytes:
            return g
    return legal[-1]


def sdpa(q_arr, k_arr, v_arr, *, embed_dim, num_heads,
         q_col_off=0, k_col_off=0, v_col_off=0, need_weights=True):
    """q_arr/k_arr/v_arr: batch-first (B, L, *) with heads packed in the last dim
    starting at *_col_off (so the kernel can read q/k/v straight out of a fused
    (B, L, 3E) projection).  Returns ctx (B, Lq, E) bf16 and, if need_weights,
    head-averaged attention weights (B, Lq, Lk) f32 (else None)."""
    B, Lq = q_arr.shape[0], q_arr.shape[1]
    Lk = k_arr.shape[1]
    H = num_heads
    hd = embed_dim // H
    G = _pick_head_group(H, hd, Lq, Lk)
    W = G * hd
    n_groups = H // G
    qb0, kb0, vb0 = q_col_off // W, k_col_off // W, v_col_off // W

    kernel = functools.partial(_attn_kernel, heads_per_step=G, head_dim=hd,
                               inv_heads=1.0 / H, with_weights=need_weights)

    ctx_spec = pl.BlockSpec((1, Lq, W), lambda b, g: (b, 0, g))
    ctx_shape = jax.ShapeDtypeStruct((B, Lq, embed_dim), COMPUTE_DTYPE)
    if need_weights:
        out_specs = (ctx_spec, pl.BlockSpec((1, Lq, Lk), lambda b, g: (b, 0, 0)))
        out_shape = (ctx_shape, jax.ShapeDtypeStruct((B, Lq, Lk), jnp.float32))
    else:
        out_specs = ctx_spec
        out_shape = ctx_shape

    out = pl.pallas_call(
        kernel,
        grid=(B, n_groups),
        in_specs=[
            pl.BlockSpec((1, Lq, W), lambda b, g: (b, 0, qb0 + g)),
            pl.BlockSpec((1, Lk, W), lambda b, g: (b, 0, kb0 + g)),
            pl.BlockSpec((1, Lk, W), lambda b, g: (b, 0, vb0 + g)),
        ],
        out_specs=out_specs,
        out_shape=out_shape,
        compiler_params=pltpu.CompilerParams(
            dimension_semantics=("parallel", "arbitrary"),
            vmem_limit_bytes=VMEM_LIMIT,
        ),
    )(q_arr.astype(COMPUTE_DTYPE), k_arr.astype(COMPUTE_DTYPE),
      v_arr.astype(COMPUTE_DTYPE))

    if need_weights:
        return out[0], out[1]
    return out, None


# ----------------------------------------------------------------------------
# Full LoRAMultiheadAttention forward (batch_first=False, no masks, dropout=0,
# average_attn_weights=True, _qkv_same_embed_dim=True).
# ----------------------------------------------------------------------------
def lora_mha_forward(query, key, value, params, num_heads, need_weights=True):
    L, B, E = query.shape
    S = key.shape[0]
    H = num_heads
    hd = E // H
    rank = params["q_w_out"].shape[1]

    in_w = params["in_proj_weight"]            # (3E, E)
    in_b = params["in_proj_bias"]              # (3E,)
    in_w_in = params["in_proj_weight_in"]      # (3*rank, E)
    qw, kw, vw = in_w[:E], in_w[E:2 * E], in_w[2 * E:]
    qb, kb, vb = in_b[:E], in_b[E:2 * E], in_b[2 * E:]
    qwi, kwi, vwi = in_w_in[:rank], in_w_in[rank:2 * rank], in_w_in[2 * rank:]

    # Fold LoRA into the base weights and the softmax scale into the q projection.
    scale = 1.0 / math.sqrt(hd)
    qw_eff = (qw + params["q_w_out"] @ qwi) * scale
    qb_eff = qb * scale
    kw_eff = kw + params["k_w_out"] @ kwi
    vw_eff = vw + params["v_w_out"] @ vwi
    ow_eff = params["out_w"] + params["out_w_out"] @ params["out_w_in"]

    same_qkv = (query is key) and (key is value)
    q_in = jnp.transpose(query, (1, 0, 2))     # batch-first (B, L, E) for the pipeline

    if same_qkv:
        # Self-attention: one fused q/k/v projection; the attention kernel reads
        # q/k/v straight out of the (B, L, 3E) result via BlockSpec column offsets.
        w_all_t = jnp.concatenate([qw_eff, kw_eff, vw_eff], axis=0).T    # (E, 3E)
        b_all = jnp.concatenate([qb_eff, kb, vb])
        qkv = fused_linear(q_in.reshape(B * L, E), w_all_t, b_all,
                           out_dtype=COMPUTE_DTYPE).reshape(B, L, 3 * E)
        ctx, attn_w = sdpa(qkv, qkv, qkv, embed_dim=E, num_heads=H,
                           q_col_off=0, k_col_off=E, v_col_off=2 * E,
                           need_weights=need_weights)
    else:
        k_in = jnp.transpose(key, (1, 0, 2))
        v_in = jnp.transpose(value, (1, 0, 2))
        q = fused_linear(q_in.reshape(B * L, E), qw_eff.T, qb_eff,
                         out_dtype=COMPUTE_DTYPE).reshape(B, L, E)
        k = fused_linear(k_in.reshape(B * S, E), kw_eff.T, kb,
                         out_dtype=COMPUTE_DTYPE).reshape(B, S, E)
        v = fused_linear(v_in.reshape(B * S, E), vw_eff.T, vb,
                         out_dtype=COMPUTE_DTYPE).reshape(B, S, E)
        ctx, attn_w = sdpa(q, k, v, embed_dim=E, num_heads=H,
                           need_weights=need_weights)

    # ctx is already (B, L, E): the out-projection consumes it with no transpose.
    out = fused_linear(ctx.reshape(B * L, E), ow_eff.T, params["out_b"],
                       out_dtype=jnp.float32).reshape(B, L, E)
    out = jnp.transpose(out, (1, 0, 2))        # back to (L, B, E)
    return out, attn_w                          # attn_w head-averaged (B, L, S) or None


# ----------------------------------------------------------------------------
# Pure-JAX f32 reference for correctness checking
# ----------------------------------------------------------------------------
def ref_forward(query, key, value, params, num_heads):
    L, B, E = query.shape
    S = key.shape[0]
    H = num_heads
    hd = E // H
    rank = params["q_w_out"].shape[1]
    in_w, in_b, in_w_in = (params["in_proj_weight"], params["in_proj_bias"],
                           params["in_proj_weight_in"])
    qw, kw, vw = in_w[:E], in_w[E:2 * E], in_w[2 * E:]
    qb, kb, vb = in_b[:E], in_b[E:2 * E], in_b[2 * E:]
    qwi, kwi, vwi = in_w_in[:rank], in_w_in[rank:2 * rank], in_w_in[2 * rank:]

    def lin(x, w, b, wi, wo):
        return x @ w.T + b + (x @ wi.T) @ wo.T

    q = lin(query, qw, qb, qwi, params["q_w_out"])
    k = lin(key, kw, kb, kwi, params["k_w_out"])
    v = lin(value, vw, vb, vwi, params["v_w_out"])
    q = q.reshape(L, B, H, hd).transpose(1, 2, 0, 3)
    k = k.reshape(S, B, H, hd).transpose(1, 2, 0, 3)
    v = v.reshape(S, B, H, hd).transpose(1, 2, 0, 3)
    s = jnp.einsum("bhqd,bhkd->bhqk", q, k) / math.sqrt(hd)
    attn = jax.nn.softmax(s, axis=-1)
    ctx = jnp.einsum("bhqk,bhkd->bhqd", attn, v)
    ctx = ctx.transpose(2, 0, 1, 3).reshape(L, B, E)
    out = lin(ctx, params["out_w"], params["out_b"],
              params["out_w_in"], params["out_w_out"])
    return out, attn.mean(axis=1)


# ----------------------------------------------------------------------------
if __name__ == "__main__":
    # seq, kv-seq, batch, embed, heads, lora rank  (head_dim = 8)
    L, S, B, E, H, rank = 8, 16, 2, 128, 16, 8

    key0 = jax.random.PRNGKey(0)
    ks = jax.random.split(key0, 12)

    query = jax.random.normal(ks[0], (L, B, E), jnp.float32)
    key_in = jax.random.normal(ks[1], (S, B, E), jnp.float32)
    value = jax.random.normal(ks[2], (S, B, E), jnp.float32)

    std = 1.0 / math.sqrt(rank)
    # NOTE: module __init__ zero-initializes *_proj_weight_out; small random
    # values are used instead so the LoRA path is actually exercised numerically.
    params = {
        "in_proj_weight": jax.random.normal(ks[3], (3 * E, E), jnp.float32) * 0.1,
        "in_proj_bias": jax.random.normal(ks[4], (3 * E,), jnp.float32) * 0.1,
        "in_proj_weight_in": jax.random.normal(ks[5], (3 * rank, E), jnp.float32) * std,
        "q_w_out": jax.random.normal(ks[6], (E, rank), jnp.float32) * 0.02,
        "k_w_out": jax.random.normal(ks[7], (E, rank), jnp.float32) * 0.02,
        "v_w_out": jax.random.normal(ks[8], (E, rank), jnp.float32) * 0.02,
        # out_proj (LoRALinear)
        "out_w": jax.random.normal(ks[9], (E, E), jnp.float32) * 0.1,
        "out_b": jax.random.normal(ks[10], (E,), jnp.float32) * 0.1,
        "out_w_in": jax.random.normal(ks[11], (rank, E), jnp.float32) * std,
        "out_w_out": jax.random.normal(ks[0], (E, rank), jnp.float32) * 0.02,
    }

    # bf16 MXU path -> compare to the f32 reference with bf16-appropriate tolerances.
    OUT_TOL = dict(atol=1e-1, rtol=5e-2)
    W_TOL = dict(atol=3e-2, rtol=5e-2)

    # --- cross-attention path (separate q/k/v projection kernels) ---
    out_x, attn_x = lora_mha_forward(query, key_in, value, params, H)
    jax.block_until_ready(out_x)
    jax.block_until_ready(attn_x)
    ref_out_x, ref_attn_x = ref_forward(query, key_in, value, params, H)
    assert out_x.shape == (L, B, E) and attn_x.shape == (B, L, S)
    assert jnp.allclose(out_x, ref_out_x, **OUT_TOL), "cross-attn output mismatch"
    assert jnp.allclose(attn_x, ref_attn_x, **W_TOL), "cross-attn weights mismatch"

    # --- self-attention path (fused stacked q/k/v projection, in-spec offsets) ---
    out_s, attn_s = lora_mha_forward(query, query, query, params, H)
    jax.block_until_ready(out_s)
    jax.block_until_ready(attn_s)
    ref_out_s, ref_attn_s = ref_forward(query, query, query, params, H)
    assert out_s.shape == (L, B, E) and attn_s.shape == (B, L, L)
    assert jnp.allclose(out_s, ref_out_s, **OUT_TOL), "self-attn output mismatch"
    assert jnp.allclose(attn_s, ref_attn_s, **W_TOL), "self-attn weights mismatch"

    # --- need_weights=False path (drops the weights output + its HBM writeback) ---
    out_nw, attn_nw = lora_mha_forward(query, query, query, params, H,
                                       need_weights=False)
    jax.block_until_ready(out_nw)
    assert attn_nw is None
    assert jnp.allclose(out_nw, ref_out_s, **OUT_TOL), "need_weights=False output mismatch"

    print("KERNEL_OK")
</pallas_src>

<mosaic_0001>
module attributes {stable_mosaic.version = 11 : i64} {
  func.func @_linear_kernel(%arg0: i32, %arg1: i32, %arg2: memref<8x128xbf16, #tpu.memory_space<vmem>>, %arg3: memref<128x128xbf16, #tpu.memory_space<vmem>>, %arg4: memref<1x128xf32, #tpu.memory_space<vmem>>, %arg5: memref<8x128xbf16, #tpu.memory_space<vmem>>) attributes {dimension_semantics = [#tpu.dimension_semantics<parallel>, #tpu.dimension_semantics<parallel>], iteration_bounds = array<i64: 2, 1>, scalar_prefetch = 0 : i64, scratch_operands = 0 : i64, tpu.core_type = #tpu.core_type<tc>, window_params = [{transform_indices = @transform_0, window_bounds = array<i64: 8, 128>}, {transform_indices = @transform_1, window_bounds = array<i64: 128, 128>}, {transform_indices = @transform_2, window_bounds = array<i64: 1, 128>}, {transform_indices = @transform_3, window_bounds = array<i64: 8, 128>}]} {
    %c0 = arith.constant 0 : index
    %c0_0 = arith.constant 0 : index
    %0 = vector.load %arg2[%c0, %c0_0] : memref<8x128xbf16, #tpu.memory_space<vmem>>, vector<8x128xbf16>
    %c0_1 = arith.constant 0 : index
    %c0_2 = arith.constant 0 : index
    %1 = vector.load %arg3[%c0_1, %c0_2] : memref<128x128xbf16, #tpu.memory_space<vmem>>, vector<128x128xbf16>
    %cst = arith.constant dense<0.000000e+00> : vector<8x128xf32>
    %2 = tpu.matmul %0, %1, %cst {dimension_numbers = #tpu.dot_dimension_numbers<[1], [0], [0], [1], [0, 0, 1, 1], [], []>} : vector<8x128xbf16>, vector<128x128xbf16>, vector<8x128xf32> -> vector<8x128xf32>
    %c0_3 = arith.constant 0 : index
    %c0_4 = arith.constant 0 : index
    %3 = vector.load %arg4[%c0_3, %c0_4] : memref<1x128xf32, #tpu.memory_space<vmem>>, vector<1x128xf32>
    %4 = vector.broadcast %3 : vector<1x128xf32> to vector<8x128xf32>
    %5 = arith.addf %2, %4 : vector<8x128xf32>
    %6 = arith.truncf %5 : vector<8x128xf32> to vector<8x128xbf16>
    %c0_5 = arith.constant 0 : index
    %c0_6 = arith.constant 0 : index
    %7 = vector.load %arg5[%c0_5, %c0_6] : memref<8x128xbf16, #tpu.memory_space<vmem>>, vector<8x128xbf16>
    tpu.vector_store %arg5[%c0_5, %c0_6], %6 {strides = array<i32>} : memref<8x128xbf16, #tpu.memory_space<vmem>>, vector<8x128xbf16>,
    return
  }
  func.func @transform_0(%arg0: i32, %arg1: i32) -> (i32, i32) {
    %c0_i32 = arith.constant 0 : i32
    %c0_i32_0 = arith.constant 0 : i32
    return %arg0, %c0_i32 : i32, i32
  }
  func.func @transform_1(%arg0: i32, %arg1: i32) -> (i32, i32) {
    %c0_i32 = arith.constant 0 : i32
    %c0_i32_0 = arith.constant 0 : i32
    return %c0_i32, %arg1 : i32, i32
  }
  func.func @transform_2(%arg0: i32, %arg1: i32) -> (i32, i32) {
    %c0_i32 = arith.constant 0 : i32
    %c0_i32_0 = arith.constant 0 : i32
    return %c0_i32, %arg1 : i32, i32
  }
  func.func @transform_3(%arg0: i32, %arg1: i32) -> (i32, i32) {
    %c0_i32 = arith.constant 0 : i32
    return %arg0, %arg1 : i32, i32
  }
}

</mosaic_0001>

<bundles_post_ra>
// kernel: tpu_custom_call.1
= control target key start
LH: loop header
LB: loop body
LE: loop exit
PB: predicated region body
PF: predicated region fallthrough
CT: control target
= control target key end

     0   :  { %8 = vsyncpa [#allocation3], 0  ;;  %s964_s0 = inlined_call_operand.hbm [shape: bf16[16,128], index: 0, kind: input, shape index: {}]   ;;  %s965_s1 = inlined_call_operand.hbm [shape: bf16[128,128], index: 1, kind: input, shape index: {}]   ;;  %s966_s2 = inlined_call_operand.vmem [shape: f32[1,128], index: 2, kind: input, shape index: {}]   ;;  %s967_s3 = inlined_call_operand.hbm [shape: bf16[16,128], index: 3, kind: output, shape index: {}]  }
   0x1   :  { %10 = vsyncpa [#allocation3 + $0x1], 0 }
   0x2   :  { %11 = vsyncpa [#allocation6], 0 }
   0x3   :  { %12 = vsyncpa [#allocation4], 0 }
   0x4   :  { %14 = vsyncpa [#allocation4 + $0x1], 0  ;;  %s775_s12 = smov 0   ;;  %s777_s13 = smov 0  }
   0x5   :  { %s779_s14 = smov 0   ;;  %s781_s15 = smov 0  }
   0x6   :  { %s783_s16 = smov 0   ;;  %s785_s17 = smov 0  }
   0x7 LB: > { %s469_s18 = sadd.s32 4294967295, %s746_s17   ;;  %s470_s19 = sadd.s32 4294967294, %s746_s17   ;;  %s746_s17 = sphi %s785_s17, %s20_s17   ;;  %s742_s16 = sphi %s783_s16, %s985_s16   ;;  %s738_s15 = sphi %s781_s15, %s984_s15   ;;  %s734_s14 = sphi %s779_s14, %s983_s14   ;;  %s730_s13 = sphi %s777_s13, %s982_s13   ;;  %s726_s12 = sphi %s775_s12, %s981_s12  }
   0x8   : > { %p52_p0 = scmp.ne.s32.totalorder %s730_s13, %s726_s12  ;;  %p809_p1 = scmp.eq.s32.totalorder %s469_s18, 0 }
   0x9   : > { %p813_p2 = scmp.eq.s32.totalorder %s469_s18, 1  ;;  %p136_p3 = scmp.eq.s32.totalorder %s470_s19, 1 }
   0xa   : > { %p819_p4 = por %p809_p1, %p52_p0  ;;  %p471_p5 = scmp.ge.s32.totalorder %s746_s17, 1 }
   0xb   : > { %p824_p6 = por %p136_p3, %p52_p0  ;;  %p143_p7 = scmp.lt.s32.totalorder %s746_s17, 3 }
   0xc   : > { %s971_s22 = scalar_select %p819_p4, 1, 0 }
   0xd   : > { %s972_s23 = scalar_select %p824_p6, 1, 0 }
   0xe   : > { %p829_p8 = pnand %p471_p5, %p143_p7  ;;  %s748_s25 = smov [#allocation5]  }
   0xf   : > { %s157_s26 = sshll.u32 %s748_s25, 4  ;;  %s32_s28 = sadd.s32 1, %s742_s16  ;;  %s158_s26 = int_to_ptr.vmem [resolvable:$true] %s157_s26 }
  0x10   : > { %p531_p9 = pneg %p829_p8  ;;  %s619_s29 = scalar_lea.vmem %s158_s26, 1024 }
  0x11   : > { %p620_p13 = scmp.ne.s32.totalorder %s158_s26, %s619_s29  ;;  %p627_p5 = scmp.lt.s32.totalorder %s158_s26, %s158_s26 }
  0x12   : > { %p838_p11 = pnand %p531_p9, %p809_p1  ;;  %p628_p7 = scmp.lt.s32.totalorder %s619_s29, %s619_s29 }
  0x14   : > { %p610_p12 = pneg %p838_p11  ;;  %p629_p6 = por %p628_p7, %p627_p5 }
  0x16   : > { %p622_p0 = pnand %p620_p13, %p610_p12 }
  0x18   : > { %p623_p3 = pneg %p622_p0 }
  0x1a   : > { %p630_p4 = pnand %p629_p6, %p623_p3 }
  0x1c   : > { %633 = shalt.err (!%p630_p4)
}
  0x1d   : > { %s749_s30 = smov 64   ;;  %s750_s4 = smov 4  }
  0x1e   : > { %534 = dma.hbm_to_vmem [thread:$0]  (!%p838_p11), %s965_s1, 1024, %s158_s26, [#allocation6], %s749_s30, %s749_s30, %s750_s4  }
  0x1f   : > { %p34_p6 = scmp.ge.s32.totalorder %s32_s28, 2  ;;  %s39_s7 = sadd.s32 1, %s734_s14 }
  0x20   : > { %p46_p4 = scmp.ne.s32.totalorder %s734_s14, %s730_s13  ;;  %p47_p9 = scmp.eq.s32.totalorder %s746_s17, 0 }
  0x21   : > { %s987_s28 = smov (%p34_p6, %s32_s28), 0  ;;  %p544_p0 = scmp.lt.s32.totalorder %s746_s17, 2 }
  0x22   : > { %p856_p12 = por %p47_p9, %p46_p4  ;;  %p862_p13 = por %p813_p2, %p46_p4 }
  0x23   : > { %s36_s10 = ssub.s32 %s742_s16, %s987_s28  ;;  %s177_s11 = sand.u32 1, %s734_s14  }
  0x24   : > { %p37_p11 = scmp.eq.s32.totalorder %s36_s10, 0  ;;  %s475_s18 = sshll.u32 %s177_s11, 2 }
  0x25   : > { %s476_s25 = sshll.u32 %s742_s16, 6  ;;  %s181_s30 = scalar_lea.vmem [#allocation2], %s475_s18 }
  0x26   : > { %s871_s19 = scalar_select %p37_p11, %s734_s14, %s39_s7  }
  0x27   : > { %s186_s29 = scalar_lea.hbm %s964_s0, %s476_s25  ;;  %s188_s4 = sshll.u32 %s181_s30, 4  ;;  %s189_s4 = int_to_ptr.vmem [resolvable:$true] %s188_s4 }
  0x28   : > { %p879_p2 = pnand %p544_p0, %p856_p12  ;;  %s178_s5 = scalar_lea.sflag [#allocation3], %s177_s11 }
  0x29   : > { %s647_s6 = scalar_lea.vmem %s189_s4, 64  ;;  %s751_s7 = smov [#allocation2]  }
  0x2a   : > { %p636_p3 = pneg %p879_p2  ;;  %p648_p5 = scmp.ne.s32.totalorder %s189_s4, %s647_s6 }
  0x2b   : > { %s652_s10 = sshll.u32 %s751_s7, 4  ;;  %s653_s10 = int_to_ptr.vmem [resolvable:$false] %s652_s10 }
  0x2c   : > { %p650_p7 = pnand %p648_p5, %p636_p3  ;;  %s654_s25 = scalar_lea.vmem %s653_s10, 128 }
  0x2d   : > { %p655_p4 = scmp.lt.s32.totalorder %s189_s4, %s653_s10  ;;  %p656_p9 = scmp.lt.s32.totalorder %s654_s25, %s647_s6 }
  0x2e   : > { %p651_p6 = pneg %p650_p7 }
  0x2f   : > { %p657_p11 = por %p656_p9, %p655_p4 }
  0x31   : > { %p658_p10 = pnand %p657_p11, %p651_p6 }
  0x33   : > { %661 = shalt.err (!%p658_p10)
}
  0x34   : > { %538 = dma.hbm_to_vmem [thread:$0]  (!%p879_p2), %s186_s29, 64, %s189_s4, %s178_s5  }
  0x35   : > { %197 = sbr.rel (%p829_p8) target bundleno = 305 (0x131), region = 32  ;;  %s890_s8 = sand.u32 (!%p829_p8), 1, %s730_s13  }
  0x36   : > { %s478_s11 = sshll.u32 (!%p829_p8), %s890_s8, 2  ;;  %s200_s18 = scalar_lea.sflag (!%p829_p8), [#allocation3], %s890_s8 }
  0x37   : > { %s896_s26 = scalar_lea.vmem (!%p829_p8), [#allocation2], %s478_s11  ;;  %p978_p12 = scmp.ne.s32.totalorder (!%p829_p8), %s971_s22, 0 }
  0x3a   : > { %713 = dma.done.wait (%p978_p12), %s200_s18, 64  }
  0x3b   : > { %715 = vsyncadd (%p978_p12), %s200_s18, 4294967232 }
  0x3c   : > { %717 = dma.done.wait (%p809_p1), [#allocation6], 1024  }
  0x3d   : > { %719 = vsyncadd (%p809_p1), [#allocation6], 4294966272  ;;  %v752_v0 = vmov 0.0   ;;  %vm753_vm0 = vmmov 0   ;;  %v600_v1 = vld [vmem:[#allocation5 + $0x38] sm:$0xff]   ;;  %v601_v2 = vld [vmem:[#allocation5 + $0x30] sm:$0xff]  }
  0x3e   : > { %503 = vmatprep.subr.bf16.mxu0 %v752_v0  ;;  %519 = vmatprep.mubr.msk.bf16.mxu0 %vm753_vm0, %v752_v0  ;;  %v602_v3 = vld [vmem:[#allocation5 + $0x28] sm:$0xff]   ;;  %v603_v4 = vld [vmem:[#allocation5 + $0x20] sm:$0xff]   ;;  %v604_v5 = vld [vmem:[#allocation5 + $0x18] sm:$0xff]   ;;  %s491_s24 = sshll.u32 %s738_s15, 6  ;;  %s232_s27 = scalar_lea.vmem [#allocation7], %s478_s11 }
  0x3f   : > { %504 = vmatpush3.bf16.msra.mxu0 %v600_v1  ;;  %v605_v6 = vld [vmem:[#allocation5 + $0x10] sm:$0xff]   ;;  %v606_v7 = vld [vmem:[#allocation5 + $0x8] sm:$0xff]   ;;  %v607_v8 = vld [vmem:[#allocation5] sm:$0xff]   ;;  %s366_s29 = sshll.u32 %s232_s27, 4  ;;  %s916_s21 = scalar_lea.hbm %s967_s3, %s491_s24  ;;  %s918_s29 = int_to_ptr.vmem [resolvable:$true] %s366_s29 }
  0x40   : > { %505 = vmatprep.subr.bf16.mxu0 %v752_v0  ;;  %v237_v9 = vld [vmem:[%s896_s26] sm:$0xf]  ;;  %s352_s15 = scalar_lea.sflag [#allocation4], %s890_s8  ;;  %s662_s5 = scalar_lea.vmem %s918_s29, 64 }
  0x41   : > { %v481_v10 = vld [vmem:[%s966_s2] ss:$0 sm:$0xff]  ;;  %p663_p1 = scmp.ne.s32.totalorder %s918_s29, %s662_s5  ;;  %s754_s6 = smov [#allocation7]  }
  0x42   : > { %s666_s7 = sshll.u32 %s754_s6, 4  ;;  %s667_s7 = int_to_ptr.vmem [resolvable:$false] %s666_s7 }
  0x43   : > { %506 = vmatpush3.bf16.msra.mxu0 %v601_v2  ;;  %p664_p8 = pnand %p663_p1, %p862_p13  ;;  %s668_s10 = scalar_lea.vmem %s667_s7, 128 }
  0x44   : > { %507 = vmatprep.subr.bf16.mxu0 %v752_v0  ;;  %p669_p0 = scmp.lt.s32.totalorder %s918_s29, %s667_s7  ;;  %p670_p2 = scmp.lt.s32.totalorder %s668_s10, %s662_s5 }
  0x45   : > { %p665_p10 = pneg %p664_p8 }
  0x46   : > { %p671_p3 = por %p670_p2, %p669_p0 }
  0x47   : > { %508 = vmatpush3.bf16.msra.mxu0 %v602_v3 }
  0x48   : > { %509 = vmatprep.subr.bf16.mxu0 %v752_v0  ;;  %p672_p5 = pnand %p671_p3, %p665_p10 }
  0x4b   : > { %510 = vmatpush3.bf16.msra.mxu0 %v603_v4 }
  0x4c   : > { %511 = vmatprep.subr.bf16.mxu0 %v752_v0 }
  0x4f   : > { %512 = vmatpush3.bf16.msra.mxu0 %v604_v5 }
  0x50   : > { %513 = vmatprep.subr.bf16.mxu0 %v752_v0 }
  0x53   : > { %514 = vmatpush3.bf16.msra.mxu0 %v605_v6 }
  0x54   : > { %515 = vmatprep.subr.bf16.mxu0 %v752_v0 }
  0x57   : > { %516 = vmatpush3.bf16.msra.mxu0 %v606_v7 }
  0x58   : > { %517 = vmatprep.subr.bf16.mxu0 %v752_v0 }
  0x5b   : > { %518 = vmatpush3.bf16.msra.mxu0 %v607_v8 }
  0x5e   : > { %520 = vmatmul.mubr.bf16.vlgmr.msra.gmra.mxu0 %v237_v9 }
 0x11e   : > { %v343_v11 = vpop.f32.mrf.mxu0 }
 0x11f   : > { %v344_v12 = vadd.f32 %v481_v10, %v343_v11 }
 0x120   : > { %v521_v13 = vpop.f32.mrf.mxu0 }
 0x121   : > { %v349_v14 = vpack.c.bf16 %v344_v12, %v344_v12 }
 0x122   : > { %v346_v15 = vpop.f32.mrf.mxu0 }
 0x123   : > { %350 = vst [vmem:[%s232_s27] sm:$0xf] %v349_v14 }
 0x124   : > { %v522_v16 = vpop.f32.mrf.mxu0 }
 0x125   : > { %675 = shalt.err (!%p672_p5)
}
 0x126   : > { %s676_s25 = scalar_lea.hbm %s916_s21, 64  ;;  %s680_s18 = scalar_lea.hbm %s967_s3, 128 }
 0x127   : > { %p677_p7 = scmp.ne.s32.totalorder %s916_s21, %s676_s25  ;;  %p681_p9 = scmp.lt.s32.totalorder %s916_s21, %s967_s3 }
 0x128   : > { %p682_p11 = scmp.lt.s32.totalorder %s680_s18, %s676_s25 }
 0x129   : > { %p678_p6 = pnand %p677_p7, %p862_p13 }
 0x12a   : > { %p683_p12 = por %p682_p11, %p681_p9 }
 0x12b   : > { %p679_p4 = pneg %p678_p6 }
 0x12d   : > { %p684_p1 = pnand %p683_p12, %p679_p4 }
 0x12f   : > { %687 = shalt.err (!%p684_p1)
}
 0x130   : > { %529 = dma.vmem_to_hbm [thread:$0]  (%p862_p13), %s918_s29, 64, %s916_s21, %s352_s15  }
 0x131 PF: > { %s378_s22 = sand.u32 1, %s726_s12   ;;  %p979_p8 = scmp.ne.s32.totalorder %s972_s23, 0 }
 0x132   : > { %p980_p10 = scmp.ge.s32.totalorder %s746_s17, 2  ;;  %s379_s24 = scalar_lea.sflag [#allocation4], %s378_s22 }
 0x134   : > { %p540_p0 = pnand %p980_p10, %p979_p8 }
 0x136   : > { %p541_p2 = pneg %p540_p0 }
 0x138   : > { %721 = dma.done.wait (%p541_p2), %s379_s24, 64  }
 0x139   : > { %723 = vsyncadd (%p541_p2), %s379_s24, 4294967232  ;;  %s20_s17 = sadd.s32 1, %s746_s17   ;;  %s981_s12 = smov %s730_s13 }
 0x13a   : > { %p17_p3 = scmp.ge.s32.totalorder %s20_s17, 4   ;;  %s982_s13 = smov %s734_s14 }
 0x13b   : > { %s983_s14 = smov %s871_s19  ;;  %s984_s15 = smov %s742_s16 }
 0x13c   : > { %s985_s16 = smov %s987_s28  ;;  %19 = sbr.rel (!%p17_p3) target bundleno = 7 (0x7), region = 85 }
 0x141   :  { %384 = vsyncpa [#allocation3], 1 }
 0x142   :  { %386 = vsyncpa [#allocation3 + $0x1], 1 }
 0x143   :  { %387 = vsyncpa [#allocation6], 1 }
 0x144   :  { %388 = vsyncpa [#allocation4], 1 }
 0x145   :  { %390 = vsyncpa [#allocation4 + $0x1], 1 }

</bundles_post_ra>
